<compile_context>
chip_gen: v7x
topology: tpu7x:2x2x1
jax: 0.10.0
libtpu: 0.0.40
codegen_flags: <defaults>
</compile_context>

<pallas_src>
import functools

import jax
import jax.numpy as jnp
import numpy as np
from jax.experimental import pallas as pl
from jax.experimental.pallas import tpu as pltpu

LANE = 128           # pad all feature dims to multiples of the 128-lane width
N_TILE = 512         # destination-row tile AND src/K tile for the aggregation
LIN_ROW_TILE = 256   # row tile for the per-node-type input projections


def _round_up(x, m):
    return ((x + m - 1) // m) * m


def _pad_to(x, shape):
    pads = [(0, t - s) for s, t in zip(x.shape, shape)]
    if not any(p for _, p in pads):
        return x
    return jnp.pad(x, pads)


def _vmem_limit_bytes():
    # Budget against physical VMEM (v7x: 64 MiB, v5e/v6e: 128 MiB) while staying
    # above the default scoped limits (16/32 MiB).
    try:
        cap = int(pltpu.get_tpu_info().vmem_capacity_bytes)
        return min(cap * 3 // 4, 100 * 1024 * 1024)
    except Exception:
        return 48 * 1024 * 1024


_VMEM_LIMIT = _vmem_limit_bytes()


# ----------------------------------------------------------------------------
# Pallas kernels
# ----------------------------------------------------------------------------
def _linear_kernel(x_ref, w_ref, b_ref, o_ref):
    # (TM, Din) @ (Din, Dout) + (1, Dout), bf16 in / f32 accumulate, out in o dtype
    o_ref[...] = (
        jnp.dot(x_ref[...], w_ref[...], preferred_element_type=jnp.float32)
        + b_ref[...]
    ).astype(o_ref.dtype)


def linear_pallas(x16, w16, b, out_dtype=jnp.bfloat16):
    """Row-tiled dense layer; x/w consumed as bf16, output dtype parameterized."""
    n, din = x16.shape
    dout = w16.shape[1]
    tm = min(LIN_ROW_TILE, _round_up(n, 16))   # 16-row alignment: bf16 packs 2 rows/sublane
    n_pad = _round_up(n, tm)
    x_p = _pad_to(x16, (n_pad, din))
    out = pl.pallas_call(
        _linear_kernel,
        out_shape=jax.ShapeDtypeStruct((n_pad, dout), out_dtype),
        grid=(n_pad // tm,),
        in_specs=[
            pl.BlockSpec((tm, din), lambda i: (i, 0)),
            pl.BlockSpec((din, dout), lambda i: (0, 0)),
            pl.BlockSpec((1, dout), lambda i: (0, 0)),
        ],
        out_specs=pl.BlockSpec((tm, dout), lambda i: (i, 0)),
        compiler_params=pltpu.CompilerParams(
            dimension_semantics=("parallel",),
            vmem_limit_bytes=_VMEM_LIMIT,
        ),
    )(x_p, w16, b)
    return out[:n]


def _basis_project_kernel(h_ref, basis_ref, o_ref):
    # HB_b tile = h_tile @ V_b   (bf16 x bf16 -> f32 -> bf16)
    o_ref[...] = jnp.dot(
        h_ref[...], basis_ref[...], preferred_element_type=jnp.float32
    ).astype(o_ref.dtype)


def basis_project_pallas(h16, bases16):
    """HB[b] = h @ V_b for every basis b.  Output bf16 (B, N_pad, Dout_pad)."""
    n_pad, din = h16.shape
    nb, _, dout = bases16.shape
    tm = min(N_TILE, n_pad)
    return pl.pallas_call(
        _basis_project_kernel,
        out_shape=jax.ShapeDtypeStruct((nb, n_pad, dout), jnp.bfloat16),
        grid=(n_pad // tm, nb),
        in_specs=[
            pl.BlockSpec((tm, din), lambda i, b: (i, 0)),
            pl.BlockSpec((None, din, dout), lambda i, b: (b, 0, 0)),
        ],
        out_specs=pl.BlockSpec((None, tm, dout), lambda i, b: (b, i, 0)),
        compiler_params=pltpu.CompilerParams(
            dimension_semantics=("parallel", "arbitrary"),
            vmem_limit_bytes=_VMEM_LIMIT,
        ),
    )(h16, bases16)


def _rgcn_agg_kernel(*refs, num_bases, apply_relu, use_self_loop):
    if use_self_loop:
        comp_ref, adj_ref, hb_ref, bias_ref, h_ref, wself_ref, out_ref, acc_ref = refs
    else:
        comp_ref, adj_ref, hb_ref, bias_ref, out_ref, acc_ref = refs
        h_ref = wself_ref = None

    k = pl.program_id(1)
    r = pl.program_id(2)

    @pl.when((k == 0) & (r == 0))
    def _init():
        acc_ref[...] = jnp.zeros_like(acc_ref)

    # Per-relation message on this K slice:
    #   msg_r = sum_b comp[r, b] * HB_b   (f32 VPU combine, bounded to (TK, dout)).
    base = r * num_bases
    msg = comp_ref[base] * hb_ref[0].astype(jnp.float32)
    for b in range(1, num_bases):
        msg = msg + comp_ref[base + b] * hb_ref[b].astype(jnp.float32)

    # Aggregate this (relation, K-slice) into the resident f32 accumulator (MXU, bf16 in).
    acc_ref[...] += jnp.dot(
        adj_ref[...], msg.astype(jnp.bfloat16), preferred_element_type=jnp.float32
    )

    @pl.when((k == pl.num_programs(1) - 1) & (r == pl.num_programs(2) - 1))
    def _finish():
        res = acc_ref[...] + bias_ref[...]
        if use_self_loop:
            res = res + jnp.dot(
                h_ref[...], wself_ref[...], preferred_element_type=jnp.float32
            )
        if apply_relu:
            res = jnp.maximum(res, 0.0)
        out_ref[...] = res.astype(out_ref.dtype)


def rgcn_aggregate_pallas(adj16, hb16, comp_flat, bias, h16=None, wself16=None,
                          apply_relu=True, out_dtype=jnp.bfloat16):
    num_rels, n_pad, _ = adj16.shape
    nb, _, dout = hb16.shape
    tm = min(N_TILE, n_pad)
    tk = min(N_TILE, n_pad)
    use_self_loop = wself16 is not None

    kernel = functools.partial(
        _rgcn_agg_kernel,
        num_bases=nb,
        apply_relu=apply_relu,
        use_self_loop=use_self_loop,
    )

    in_specs = [
        pl.BlockSpec(memory_space=pltpu.MemorySpace.SMEM),          # comp_flat (R*B,)
        pl.BlockSpec((None, tm, tk), lambda m, k, r: (r, m, k)),    # adj (dst, src) tile
        pl.BlockSpec((nb, tk, dout), lambda m, k, r: (0, k, 0)),    # HB K-slice (bf16)
        pl.BlockSpec((1, dout), lambda m, k, r: (0, 0)),            # bias
    ]
    args = [comp_flat, adj16, hb16, bias]
    if use_self_loop:
        din = h16.shape[1]
        in_specs += [
            pl.BlockSpec((tm, din), lambda m, k, r: (m, 0)),        # h dst-tile
            pl.BlockSpec((din, dout), lambda m, k, r: (0, 0)),      # W_self (resident)
        ]
        args += [h16, wself16]

    # Relation axis innermost: the HB block index (0, k, 0) is constant across it,
    # so HB is DMA'd once per (m, k) instead of once per (m, k, r).
    return pl.pallas_call(
        kernel,
        out_shape=jax.ShapeDtypeStruct((n_pad, dout), out_dtype),
        grid=(n_pad // tm, n_pad // tk, num_rels),
        in_specs=in_specs,
        out_specs=pl.BlockSpec((tm, dout), lambda m, k, r: (m, 0)),
        scratch_shapes=[pltpu.VMEM((tm, dout), jnp.float32)],
        compiler_params=pltpu.CompilerParams(
            dimension_semantics=("parallel", "arbitrary", "arbitrary"),
            vmem_limit_bytes=_VMEM_LIMIT,
        ),
    )(*args)


# ----------------------------------------------------------------------------
# Model (parameter setup + graph glue in plain JAX; compute in Pallas)
# ----------------------------------------------------------------------------
def _glorot(key, shape):
    fan_in, fan_out = shape[-2], shape[-1]
    lim = float(np.sqrt(6.0 / (fan_in + fan_out)))
    return jax.random.uniform(key, shape, jnp.float32, -lim, lim)


def build_dense_adj(src, dst, rel, norm, num_rels, n_pad):
    # glue: dense per-relation normalized adjacency A[r, dst, src] += norm.
    # TODO(synk): real RGCN graphs are >99% sparse; a block-sparse / scalar-prefetch
    # formulation that skips all-zero adjacency tiles would remove most HBM traffic.
    return jnp.zeros((num_rels, n_pad, n_pad), jnp.float32).at[rel, dst, src].add(norm)


class BaseRGCNPallas:
    """Concrete BaseRGCN: per-node-type Linear i2h, `num_hidden_layers` basis
    RelGraphConv hidden layers (h_dim->h_dim, ReLU), output RelGraphConv layer
    (h_dim->out_dim, no activation)."""

    def __init__(self, in_dims, h_dim, out_dim, num_rels, num_bases,
                 num_hidden_layers=1, dropout=0.0, use_self_loop=False, seed=0):
        self.in_dims = list(in_dims)
        self.h_dim = h_dim
        self.out_dim = out_dim
        self.num_rels = num_rels
        self.num_bases = num_rels if num_bases < 0 else num_bases
        self.num_hidden_layers = num_hidden_layers
        self.dropout = dropout  # TODO(synk): dropout==0 by default; in-kernel RNG dropout not implemented.
        self.use_self_loop = use_self_loop

        # lane-padded dims (multiples of 128)
        self.h_pad = _round_up(h_dim, LANE)
        self.out_pad = _round_up(out_dim, LANE)
        self.in_pads = [_round_up(d, LANE) for d in self.in_dims]

        key = jax.random.PRNGKey(seed)
        keys = iter(jax.random.split(key, 64))

        # i2h: one Linear per node type (weights stored zero-padded, bf16 once).
        self.i2h = []
        for d, d_pad in zip(self.in_dims, self.in_pads):
            w = _pad_to(_glorot(next(keys), (d, h_dim)), (d_pad, self.h_pad))
            b = jnp.zeros((1, self.h_pad), jnp.float32)
            self.i2h.append((w.astype(jnp.bfloat16), b))

        # hidden RelGraphConv layers + output layer (basis decomposition), bf16 weights.
        dims = [(self.h_pad, self.h_pad, h_dim, h_dim, True)] * num_hidden_layers
        dims += [(self.h_pad, self.out_pad, h_dim, out_dim, False)]
        self.layers = []
        for din_p, dout_p, din, dout, relu in dims:
            bases = _glorot(next(keys), (self.num_bases, din, dout))
            layer = {
                "bases16": _pad_to(bases, (self.num_bases, din_p, dout_p)).astype(jnp.bfloat16),
                "comp_flat": _glorot(next(keys), (num_rels, self.num_bases)).reshape(-1),
                "bias": jnp.zeros((1, dout_p), jnp.float32),
                "relu": relu,
            }
            if use_self_loop:
                layer["wself16"] = _pad_to(
                    _glorot(next(keys), (din, dout)), (din_p, dout_p)
                ).astype(jnp.bfloat16)
            self.layers.append(layer)

    def forward(self, src, dst, features_list, rel, norm):
        n_real = sum(int(x.shape[0]) for x in features_list)
        n_pad = _round_up(n_real, N_TILE)

        # per-node-type input projection (Pallas row-tiled linear, bf16 out) + concat
        hs = []
        for x, (w16, b), d_pad in zip(features_list, self.i2h, self.in_pads):
            x16 = _pad_to(x.astype(jnp.float32), (x.shape[0], d_pad)).astype(jnp.bfloat16)
            hs.append(linear_pallas(x16, w16, b, out_dtype=jnp.bfloat16))
        h16 = _pad_to(jnp.concatenate(hs, axis=0), (n_pad, self.h_pad))

        # dense normalized adjacency, streamed as bf16
        adj16 = build_dense_adj(src, dst, rel, norm, self.num_rels,
                                n_pad).astype(jnp.bfloat16)

        out = None
        for li, layer in enumerate(self.layers):
            last = li == len(self.layers) - 1
            hb16 = basis_project_pallas(h16, layer["bases16"])
            out = rgcn_aggregate_pallas(
                adj16, hb16, layer["comp_flat"], layer["bias"],
                h16=h16 if self.use_self_loop else None,
                wself16=layer.get("wself16"),
                apply_relu=layer["relu"],
                out_dtype=jnp.float32 if last else jnp.bfloat16,
            )
            h16 = out   # hidden layers emit bf16 directly; final layer emits f32
        return out[:n_real, :self.out_dim]


# ----------------------------------------------------------------------------
# Pure-JAX reference (mirrors the kernels' bf16-compute / f32-accumulate)
# ----------------------------------------------------------------------------
def reference_forward(model, src, dst, features_list, rel, norm):
    f32, bf16 = jnp.float32, jnp.bfloat16
    n_real = sum(int(x.shape[0]) for x in features_list)
    n_pad = _round_up(n_real, N_TILE)

    hs = []
    for x, (w16, b), d_pad in zip(features_list, model.i2h, model.in_pads):
        x16 = _pad_to(x.astype(f32), (x.shape[0], d_pad)).astype(bf16).astype(f32)
        h = x16 @ w16.astype(f32) + b
        hs.append(h.astype(bf16).astype(f32))          # linear kernel emits bf16
    h = _pad_to(jnp.concatenate(hs, axis=0), (n_pad, model.h_pad))

    adj = build_dense_adj(src, dst, rel, norm, model.num_rels, n_pad)
    adj = adj.astype(bf16).astype(f32)

    for layer in model.layers:
        h16 = h.astype(bf16)
        hb = jnp.einsum("ni,bio->bno", h16.astype(f32),
                        layer["bases16"].astype(f32)).astype(bf16)
        msg = jnp.einsum("rb,bno->rno",
                         layer["comp_flat"].reshape(model.num_rels, model.num_bases),
                         hb.astype(f32))
        out = jnp.einsum("rmn,rno->mo", adj, msg.astype(bf16).astype(f32))
        out = out + layer["bias"]
        if "wself16" in layer:
            out = out + h16.astype(f32) @ layer["wself16"].astype(f32)
        if layer["relu"]:
            out = jnp.maximum(out, 0.0)
        h = out
    return h[:n_real, :model.out_dim]


# ----------------------------------------------------------------------------
if __name__ == "__main__":
    key = jax.random.PRNGKey(0)
    keys = jax.random.split(key, 8)

    in_dims = [12, 20]            # two node types with different feature dims
    n_per_type = [10, 6]
    h_dim, out_dim = 32, 16
    num_rels, num_bases = 3, 2
    N = sum(n_per_type)
    E = 40

    features_list = [
        jax.random.normal(keys[i], (n, d), jnp.float32)
        for i, (n, d) in enumerate(zip(n_per_type, in_dims))
    ]
    src = jax.random.randint(keys[2], (E,), 0, N)
    dst = jax.random.randint(keys[3], (E,), 0, N)
    rel = jax.random.randint(keys[4], (E,), 0, num_rels)
    norm = jax.random.uniform(keys[5], (E,), jnp.float32, 0.1, 1.0)

    for use_self_loop in (False, True):
        model = BaseRGCNPallas(
            in_dims, h_dim, out_dim, num_rels, num_bases,
            num_hidden_layers=1, dropout=0.0,
            use_self_loop=use_self_loop, seed=42,
        )
        out = jax.block_until_ready(model.forward(src, dst, features_list, rel, norm))
        ref = reference_forward(model, src, dst, features_list, rel, norm)
        np.testing.assert_allclose(np.asarray(out), np.asarray(ref),
                                   rtol=1e-2, atol=1e-2)

    print("KERNEL_OK")
</pallas_src>

<mosaic_0001>
module attributes {stable_mosaic.version = 11 : i64} {
  func.func @_linear_kernel(%arg0: i32, %arg1: memref<16x128xbf16, #tpu.memory_space<vmem>>, %arg2: memref<128x128xbf16, #tpu.memory_space<vmem>>, %arg3: memref<1x128xf32, #tpu.memory_space<vmem>>, %arg4: memref<16x128xbf16, #tpu.memory_space<vmem>>) attributes {dimension_semantics = [#tpu.dimension_semantics<parallel>], iteration_bounds = array<i64: 1>, scalar_prefetch = 0 : i64, scratch_operands = 0 : i64, tpu.core_type = #tpu.core_type<tc>, window_params = [{transform_indices = @transform_0, window_bounds = array<i64: 16, 128>}, {pipeline_mode = #tpu.pipeline_mode<synchronous>, transform_indices = @transform_1, window_bounds = array<i64: 128, 128>}, {pipeline_mode = #tpu.pipeline_mode<synchronous>, transform_indices = @transform_2, window_bounds = array<i64: 1, 128>}, {transform_indices = @transform_3, window_bounds = array<i64: 16, 128>}]} {
    %c0 = arith.constant 0 : index
    %c0_0 = arith.constant 0 : index
    %0 = vector.load %arg1[%c0, %c0_0] : memref<16x128xbf16, #tpu.memory_space<vmem>>, vector<16x128xbf16>
    %c0_1 = arith.constant 0 : index
    %c0_2 = arith.constant 0 : index
    %1 = vector.load %arg2[%c0_1, %c0_2] : memref<128x128xbf16, #tpu.memory_space<vmem>>, vector<128x128xbf16>
    %cst = arith.constant dense<0.000000e+00> : vector<16x128xf32>
    %2 = tpu.matmul %0, %1, %cst {dimension_numbers = #tpu.dot_dimension_numbers<[1], [0], [0], [1], [0, 0, 1, 1], [], []>} : vector<16x128xbf16>, vector<128x128xbf16>, vector<16x128xf32> -> vector<16x128xf32>
    %c0_3 = arith.constant 0 : index
    %c0_4 = arith.constant 0 : index
    %3 = vector.load %arg3[%c0_3, %c0_4] : memref<1x128xf32, #tpu.memory_space<vmem>>, vector<1x128xf32>
    %4 = vector.broadcast %3 : vector<1x128xf32> to vector<16x128xf32>
    %5 = arith.addf %2, %4 : vector<16x128xf32>
    %6 = arith.truncf %5 : vector<16x128xf32> to vector<16x128xbf16>
    %c0_5 = arith.constant 0 : index
    %c0_6 = arith.constant 0 : index
    %7 = vector.load %arg4[%c0_5, %c0_6] : memref<16x128xbf16, #tpu.memory_space<vmem>>, vector<16x128xbf16>
    tpu.vector_store %arg4[%c0_5, %c0_6], %6 {strides = array<i32>} : memref<16x128xbf16, #tpu.memory_space<vmem>>, vector<16x128xbf16>,
    return
  }
  func.func @transform_0(%arg0: i32) -> (i32, i32) {
    %c0_i32 = arith.constant 0 : i32
    %c0_i32_0 = arith.constant 0 : i32
    return %arg0, %c0_i32 : i32, i32
  }
  func.func @transform_1(%arg0: i32) -> (i32, i32) {
    %c0_i32 = arith.constant 0 : i32
    %c0_i32_0 = arith.constant 0 : i32
    %c0_i32_1 = arith.constant 0 : i32
    return %c0_i32, %c0_i32_0 : i32, i32
  }
  func.func @transform_2(%arg0: i32) -> (i32, i32) {
    %c0_i32 = arith.constant 0 : i32
    %c0_i32_0 = arith.constant 0 : i32
    %c0_i32_1 = arith.constant 0 : i32
    return %c0_i32, %c0_i32_0 : i32, i32
  }
  func.func @transform_3(%arg0: i32) -> (i32, i32) {
    %c0_i32 = arith.constant 0 : i32
    %c0_i32_0 = arith.constant 0 : i32
    return %arg0, %c0_i32 : i32, i32
  }
}

</mosaic_0001>

<bundles_post_ra>
// kernel: tpu_custom_call.1
= control target key start
LH: loop header
LB: loop body
LE: loop exit
PB: predicated region body
PF: predicated region fallthrough
CT: control target
= control target key end

     0   :  { %8 = vsyncpa [#allocation3], 0  ;;  %s403_s0 = inlined_call_operand.hbm [shape: bf16[16,128], index: 0, kind: input, shape index: {}]   ;;  %s404_s1 = inlined_call_operand.hbm [shape: bf16[128,128], index: 1, kind: input, shape index: {}]   ;;  %s405_s2 = inlined_call_operand.vmem [shape: f32[1,128], index: 2, kind: input, shape index: {}]   ;;  %s406_s3 = inlined_call_operand.hbm [shape: bf16[16,128], index: 3, kind: output, shape index: {}]  }
   0x1   :  { %9 = vsyncpa [#allocation6], 0 }
   0x2   :  { %10 = vsyncpa [#allocation4], 0  ;;  %s328_s12 = smov [#allocation2]   ;;  %s256_s16 = scalar_lea.hbm %s403_s0, 128 }
   0x3   :  { %s16_s13 = sshll.u32 %s328_s12, 4  ;;  %p257_p0 = scmp.ne.s32.totalorder %s403_s0, %s256_s16  ;;  %s17_s13 = int_to_ptr.vmem [resolvable:$true] %s16_s13 }
   0x4   :  { %p260_p1 = scmp.lt.u32.totalorder %s256_s16, %s403_s0 }
   0x6   :  { %p262_p2 = pnand %p260_p1, %p257_p0 }
   0x8   :  { %265 = shalt.err (!%p262_p2)
}
   0x9   :  { %s266_s21 = scalar_lea.vmem %s17_s13, 128  ;;  %p271_p4 = scmp.lt.s32.totalorder %s17_s13, %s17_s13 }
   0xa   :  { %p267_p3 = scmp.ne.s32.totalorder %s17_s13, %s266_s21  ;;  %p272_p5 = scmp.lt.s32.totalorder %s266_s21, %s266_s21 }
   0xc   :  { %p273_p6 = por %p272_p5, %p271_p4 }
   0xe   :  { %p274_p7 = pnand %p273_p6, %p267_p3 }
  0x10   :  { %277 = shalt.err (!%p274_p7)
}
  0x11   :  { %s329_s22 = smov 64   ;;  %s330_s23 = smov 4  }
  0x12   :  { %22 = dma.hbm_to_vmem [thread:$0]  %s403_s0, 128, %s17_s13, [#allocation3], %s329_s22, %s329_s22, %s330_s23  }
  0x13   :  { %s331_s26 = smov [#allocation5]   ;;  %s278_s30 = scalar_lea.hbm %s404_s1, 1024 }
  0x14   :  { %s28_s27 = sshll.u32 %s331_s26, 4  ;;  %p279_p8 = scmp.ne.s32.totalorder %s404_s1, %s278_s30  ;;  %s29_s27 = int_to_ptr.vmem [resolvable:$true] %s28_s27 }
  0x15   :  { %p282_p9 = scmp.lt.u32.totalorder %s278_s30, %s404_s1 }
  0x17   :  { %p284_p10 = pnand %p282_p9, %p279_p8 }
  0x19   :  { %287 = shalt.err (!%p284_p10)
}
  0x1a   :  { %s288_s8 = scalar_lea.vmem %s29_s27, 1024  ;;  %p293_p12 = scmp.lt.s32.totalorder %s29_s27, %s29_s27 }
  0x1b   :  { %p289_p11 = scmp.ne.s32.totalorder %s29_s27, %s288_s8  ;;  %p294_p13 = scmp.lt.s32.totalorder %s288_s8, %s288_s8 }
  0x1d   :  { %p295_p0 = por %p294_p13, %p293_p12 }
  0x1f   :  { %p296_p1 = pnand %p295_p0, %p289_p11 }
  0x21   :  { %299 = shalt.err (!%p296_p1)
}
  0x22   :  { %34 = dma.hbm_to_vmem [thread:$0]  %s404_s1, 1024, %s29_s27, [#allocation6], %s329_s22, %s329_s22, %s330_s23  }
  0x23   :  { %322 = dma.done.wait [#allocation3], 128  }
  0x24   :  { %323 = vsyncadd [#allocation3], 4294967168 }
  0x25   :  { %324 = dma.done.wait [#allocation6], 1024  }
  0x26   :  { %325 = vsyncadd [#allocation6], 4294966272  ;;  %v332_v0 = vmov 0.0   ;;  %vm333_vm0 = vmmov 0   ;;  %v247_v1 = vld [vmem:[#allocation5] sm:$0xff]   ;;  %v248_v2 = vld [vmem:[#allocation5 + $0x8] sm:$0xff]  }
  0x27   :  { %220 = vmatprep.subr.bf16.mxu0 %v332_v0  ;;  %236 = vmatprep.mubr.msk.bf16.mxu0 %vm333_vm0, %v332_v0  ;;  %v249_v3 = vld [vmem:[#allocation5 + $0x10] sm:$0xff]   ;;  %v250_v4 = vld [vmem:[#allocation5 + $0x18] sm:$0xff]   ;;  %v251_v5 = vld [vmem:[#allocation5 + $0x20] sm:$0xff]   ;;  %s334_s11 = smov [#allocation7]  }
  0x28   :  { %221 = vmatpush3.bf16.msra.mxu0 %v247_v1  ;;  %v252_v6 = vld [vmem:[#allocation5 + $0x28] sm:$0xff]   ;;  %v253_v7 = vld [vmem:[#allocation5 + $0x30] sm:$0xff]   ;;  %v254_v8 = vld [vmem:[#allocation5 + $0x38] sm:$0xff]   ;;  %s179_s12 = sshll.u32 %s334_s11, 4  ;;  %s180_s12 = int_to_ptr.vmem [resolvable:$true] %s179_s12 }
  0x29   :  { %222 = vmatprep.subr.bf16.mxu0 %v332_v0  ;;  %v255_v9 = vld [vmem:[#allocation2] sm:$0xff]   ;;  %s300_s13 = scalar_lea.vmem %s180_s12, 128  ;;  %p305_p3 = scmp.lt.s32.totalorder %s180_s12, %s180_s12 }
  0x2a   :  { %v192_v10 = vld [vmem:[%s405_s2] ss:$0 sm:$0xff]  ;;  %p301_p2 = scmp.ne.s32.totalorder %s180_s12, %s300_s13  ;;  %p306_p4 = scmp.lt.s32.totalorder %s300_s13, %s300_s13 }
  0x2c   :  { %223 = vmatpush3.bf16.msra.mxu0 %v248_v2  ;;  %p307_p5 = por %p306_p4, %p305_p3 }
  0x2d   :  { %224 = vmatprep.subr.bf16.mxu0 %v332_v0 }
  0x2e   :  { %p308_p6 = pnand %p307_p5, %p301_p2 }
  0x30   :  { %225 = vmatpush3.bf16.msra.mxu0 %v249_v3 }
  0x31   :  { %226 = vmatprep.subr.bf16.mxu0 %v332_v0 }
  0x34   :  { %227 = vmatpush3.bf16.msra.mxu0 %v250_v4 }
  0x35   :  { %228 = vmatprep.subr.bf16.mxu0 %v332_v0 }
  0x38   :  { %229 = vmatpush3.bf16.msra.mxu0 %v251_v5 }
  0x39   :  { %230 = vmatprep.subr.bf16.mxu0 %v332_v0 }
  0x3c   :  { %231 = vmatpush3.bf16.msra.mxu0 %v252_v6 }
  0x3d   :  { %232 = vmatprep.subr.bf16.mxu0 %v332_v0 }
  0x40   :  { %233 = vmatpush3.bf16.msra.mxu0 %v253_v7 }
  0x41   :  { %234 = vmatprep.subr.bf16.mxu0 %v332_v0 }
  0x44   :  { %235 = vmatpush3.bf16.msra.mxu0 %v254_v8 }
  0x47   :  { %237 = vmatmul.mubr.bf16.vlgmr.msra.gmra.mrb[0].mxu0 %v255_v9 }
 0x11a   :  { %v157_v11 = vpop.f32.mrb[0].mxu0 }
 0x11b   :  { %v238_v12 = vpop.f32.mrb[1].mxu0  ;;  %v158_v14 = vadd.f32 %v192_v10, %v157_v11 }
 0x11c   :  { %v160_v13 = vpop.f32.mrb[2].mxu0 }
 0x11d   :  { %v161_v15 = vadd.f32 %v192_v10, %v160_v13  ;;  %v239_v16 = vpop.f32.mrb[3].mxu0 }
 0x11f   :  { %v209_v17 = vpack.c.bf16 %v161_v15, %v158_v14 }
 0x121   :  { %210 = vst [vmem:[#allocation7] sm:$0xff] %v209_v17  }
 0x122   :  { %311 = shalt.err (!%p308_p6)
}
 0x123   :  { %s312_s15 = scalar_lea.hbm %s406_s3, 128 }
 0x124   :  { %p313_p7 = scmp.ne.s32.totalorder %s406_s3, %s312_s15  ;;  %p316_p8 = scmp.lt.u32.totalorder %s312_s15, %s406_s3 }
 0x126   :  { %p318_p9 = pnand %p316_p8, %p313_p7 }
 0x128   :  { %321 = shalt.err (!%p318_p9)
}
 0x129   :  { %185 = dma.vmem_to_hbm [thread:$0]  %s180_s12, 128, %s406_s3, [#allocation4], %s329_s22, %s329_s22, %s330_s23  }
 0x12a   :  { %326 = dma.done.wait [#allocation4], 128  }
 0x12b   :  { %327 = vsyncadd [#allocation4], 4294967168 }
 0x12c   :  { %189 = vsyncpa [#allocation3], 1 }
 0x12d   :  { %190 = vsyncpa [#allocation6], 1 }
 0x12e   :  { %191 = vsyncpa [#allocation4], 1 }

</bundles_post_ra>
